<compile_context>
chip_gen: v7x
topology: tpu7x:2x2x1
jax: 0.10.0
libtpu: 0.0.40
codegen_flags: <defaults>
</compile_context>

<pallas_src>
import functools

import jax
import jax.numpy as jnp
import numpy as np
from jax.experimental import pallas as pl
from jax.experimental.pallas import tpu as pltpu


def _cdiv(a, b):
    return (a + b - 1) // b


# --------------------------------------------------------------------------
# Kernel
# --------------------------------------------------------------------------
def _rkl_kernel(acc_in_ref, labels_ref, s_ref, t_ref, out_ref,
                num_acc, m_s, r_s, w_s, z_s, m_t, r_t, *,
                ignore_index, n_rows, row_tile, vocab, vocab_tile,
                steps_per_part, needs_row_mask):
    """One (row_tile, vocab_tile) tile of one chunk.

    Grid = (partition, row_block, vocab_block).  Online-softmax state lives in
    (row_tile, 1) scratch and is reset at vocab_block == 0; the per-partition
    numerator accumulator is reduced and written (added to the running
    cross-chunk accumulator) only at the partition's final grid step.
    """
    p = pl.program_id(0)
    i = pl.program_id(1)
    vb = pl.program_id(2)
    last_i = pl.num_programs(1) - 1
    last_vb = pl.num_programs(2) - 1

    zeros = jnp.zeros((row_tile, 1), jnp.float32)
    neg_inf = jnp.full((row_tile, 1), -jnp.inf, jnp.float32)

    # Zero the per-partition numerator accumulator at the partition's first step.
    @pl.when((i == 0) & (vb == 0))
    def _():
        num_acc[...] = zeros

    # Reset the per-row online-softmax state at the start of every row block.
    @pl.when(vb == 0)
    def _():
        m_s[...] = neg_inf
        m_t[...] = neg_inf
        r_s[...] = zeros
        r_t[...] = zeros
        w_s[...] = zeros
        z_s[...] = zeros

    s_nat = s_ref[...]                      # (TM, TV) native dtype (e.g. bf16)
    t_nat = t_ref[...]

    if vocab % vocab_tile != 0:
        # Partial last vocab tile: poison padding columns with -inf so they
        # drop out of max/sum-exp and are excluded by the inf mask.
        col = vb * vocab_tile + jax.lax.broadcasted_iota(jnp.int32, s_nat.shape, 1)
        col_ok = col < vocab
        ninf = jnp.array(-jnp.inf, dtype=s_nat.dtype)
        s_nat = jnp.where(col_ok, s_nat, ninf)
        t_nat = jnp.where(col_ok, t_nat, ninf)

    # isinf + row maxima on the narrow dtype (exact) before upcasting.
    inf_mask = jnp.isinf(s_nat) | jnp.isinf(t_nat)
    tile_max_s = jnp.max(s_nat, axis=-1, keepdims=True).astype(jnp.float32)
    tile_max_t = jnp.max(t_nat, axis=-1, keepdims=True).astype(jnp.float32)

    # Upcast one tile at a time (mirrors dtype=torch.float32 in the reference).
    s = s_nat.astype(jnp.float32)
    t = t_nat.astype(jnp.float32)

    # --- student online softmax state update ---------------------------------
    m_s_old = m_s[...]
    m_s_new = jnp.maximum(m_s_old, tile_max_s)
    alpha = jnp.exp(m_s_old - m_s_new)               # (TM, 1) rescale factor
    e_s = jnp.exp(s - m_s_new)                       # (TM, TV)
    prod = jnp.where(inf_mask, 0.0, e_s * (t - s))   # fused masked product
    z_el = jnp.where(inf_mask, 0.0, e_s)             # masked softmax mass
    r_s[...] = alpha * r_s[...] + jnp.sum(e_s, axis=-1, keepdims=True)
    w_s[...] = alpha * w_s[...] + jnp.sum(prod, axis=-1, keepdims=True)
    z_s[...] = alpha * z_s[...] + jnp.sum(z_el, axis=-1, keepdims=True)
    m_s[...] = m_s_new

    # --- teacher online logsumexp state update -------------------------------
    m_t_old = m_t[...]
    m_t_new = jnp.maximum(m_t_old, tile_max_t)
    r_t[...] = (jnp.exp(m_t_old - m_t_new) * r_t[...]
                + jnp.sum(jnp.exp(t - m_t_new), axis=-1, keepdims=True))
    m_t[...] = m_t_new

    # --- finalize this row block once the vocab sweep completes --------------
    @pl.when(vb == last_vb)
    def _():
        # per-row constant (t_lse - s_lse); per-row exact divide (tiny).
        c = (m_t[...] + jnp.log(r_t[...])) - (m_s[...] + jnp.log(r_s[...]))
        x = (w_s[...] - c * z_s[...]) / r_s[...]     # (TM, 1)
        valid = labels_ref[...] != ignore_index
        if needs_row_mask:
            row = ((p * steps_per_part + i) * row_tile
                   + jax.lax.broadcasted_iota(jnp.int32, (row_tile, 1), 0))
            valid = valid & (row < n_rows)
        num_acc[...] += jnp.where(valid, x, 0.0)     # select (NaN-safe)

    # --- partition done: fold into the cross-chunk running accumulator -------
    @pl.when((vb == last_vb) & (i == last_i))
    def _():
        out_ref[...] = acc_in_ref[...] + jnp.sum(num_acc[...])


# --------------------------------------------------------------------------
# Generation-aware sizing
# --------------------------------------------------------------------------
def _vmem_plan():
    """Returns (tile_budget_bytes, vmem_limit_bytes, row_cap)."""
    try:
        cap = int(pltpu.get_tpu_info().vmem_capacity_bytes)
    except Exception:
        cap = 64 * 1024 * 1024
    if cap >= 100 * 1024 * 1024:           # v5e / v6e: 128 MiB VMEM
        return 48 * 1024 * 1024, 80 * 1024 * 1024, 1024
    else:                                   # v7x: 64 MiB VMEM
        return 20 * 1024 * 1024, 44 * 1024 * 1024, 512


def _pick_tiles(n_rows, vocab, budget_bytes, row_cap):
    """Pick (row_tile, vocab_tile) so the working set fits the VMEM budget.

    Working set per element ~= 2 bf16 inputs x 2 pipeline buffers (8 B) plus
    ~8 live float32 intermediates (32 B) ~= 40 B.
    """
    bytes_per_elem = 40
    max_elems = max(budget_bytes // bytes_per_elem, 16 * 128)

    # Vocab tile: full vocab when small, else a big multiple of 128 so the
    # per-(row, vocab-step) online-state update is well amortized.
    if vocab <= 4096:
        tv = vocab
    else:
        tv = min(4096, (max_elems // 16 // 128) * 128)
        tv = max(tv, 128)
        for cand in range(tv, 127, -128):   # prefer a divisor (no column mask)
            if vocab % cand == 0:
                tv = cand
                break

    # Row tile: biggest multiple of 16 that fits the budget with this tv.
    tm = max_elems // max(tv, 1)
    tm = int(max(16, (tm // 16) * 16))
    tm = min(tm, row_cap)
    if n_rows <= 16:
        tm = n_rows                          # single full-extent row block
    elif tm > n_rows:
        tm = max(16, (n_rows // 16) * 16)    # partial last block masked in-kernel
    return tm, tv


# --------------------------------------------------------------------------
# Per-chunk pallas_call
# --------------------------------------------------------------------------
def _rkl_chunk_partials(acc, l2d, s2d, t2d, *, ignore_index, row_tile,
                        vocab_tile, num_partitions, budget, vmem_limit,
                        row_cap):
    """Run the kernel over one flattened chunk, adding into `acc` (P,1,128)."""
    n_rows, vocab = s2d.shape
    tm_auto, tv_auto = _pick_tiles(n_rows, vocab, budget, row_cap)

    if row_tile is None:
        tm = tm_auto
    else:
        tm = int(row_tile)
        tm = n_rows if tm >= n_rows else max(8, (tm // 8) * 8)

    if vocab_tile is None:
        tv = tv_auto
    else:
        tv = int(vocab_tile)
        tv = vocab if tv >= vocab else max(128, (tv // 128) * 128)

    total_blocks = _cdiv(n_rows, tm)
    p_parts = max(1, int(num_partitions))
    steps = _cdiv(total_blocks, p_parts)          # may overrun; masked in-kernel
    vsteps = _cdiv(vocab, tv)
    needs_row_mask = (p_parts * steps * tm) != n_rows

    kernel = functools.partial(
        _rkl_kernel, ignore_index=ignore_index, n_rows=n_rows, row_tile=tm,
        vocab=vocab, vocab_tile=tv, steps_per_part=steps,
        needs_row_mask=needs_row_mask)

    def _row_block(p, i):
        # Clamp so overrun steps re-read the last valid block (never OOB);
        # the in-kernel row mask zeroes their contribution.
        return jnp.minimum(p * steps + i, total_blocks - 1)

    lbl_idx = lambda p, i, vb: (_row_block(p, i), 0)
    st_idx = lambda p, i, vb: (_row_block(p, i), vb)
    acc_idx = lambda p, i, vb: (p, 0, 0)

    return pl.pallas_call(
        kernel,
        out_shape=jax.ShapeDtypeStruct((p_parts, 1, 128), jnp.float32),
        grid_spec=pltpu.PrefetchScalarGridSpec(
            num_scalar_prefetch=0,
            grid=(p_parts, steps, vsteps),
            in_specs=[
                pl.BlockSpec((1, 1, 128), acc_idx),      # running accumulator
                pl.BlockSpec((tm, 1), lbl_idx),          # labels
                pl.BlockSpec((tm, tv), st_idx),          # student logits
                pl.BlockSpec((tm, tv), st_idx),          # teacher logits
            ],
            out_specs=pl.BlockSpec((1, 1, 128), acc_idx),
            scratch_shapes=[pltpu.VMEM((tm, 1), jnp.float32)] * 7,
        ),
        compiler_params=pltpu.CompilerParams(
            dimension_semantics=("parallel", "arbitrary", "arbitrary"),
            vmem_limit_bytes=vmem_limit,
        ),
        input_output_aliases={0: 0},                     # acc is updated in place
    )(acc, l2d, s2d, t2d)


# --------------------------------------------------------------------------
# Public wrapper (forward pass of ReverseKLWithChunkedOutputLoss)
# --------------------------------------------------------------------------
def reverse_kl_chunked_loss(student_chunks, teacher_chunks, labels,
                            ignore_index=-100, row_tile=None, vocab_tile=None,
                            num_partitions=2):
    """JAX/Pallas equivalent of ReverseKLWithChunkedOutputLoss.forward.

    student_chunks / teacher_chunks: lists of (bsz, tokens_per_chunk, vocab)
      arrays (e.g. bf16).  labels: (bsz, num_tokens) int32.  Returns f32 scalar.
    """
    vocab = student_chunks[0].shape[-1]
    tok_sizes = [int(c.shape[1]) for c in student_chunks]
    offs = np.concatenate([[0], np.cumsum(tok_sizes)]).astype(int)

    budget, vmem_limit, row_cap = _vmem_plan()
    p_parts = max(1, int(num_partitions))

    acc = jnp.zeros((p_parts, 1, 128), jnp.float32)
    for k, (sc, tc) in enumerate(zip(student_chunks, teacher_chunks)):
        s2d = sc.reshape(-1, vocab)                      # free reshape
        t2d = tc.reshape(-1, vocab)
        l2d = labels[:, offs[k]:offs[k + 1]].reshape(-1, 1).astype(jnp.int32)
        acc = _rkl_chunk_partials(acc, l2d, s2d, t2d, ignore_index=ignore_index,
                                  row_tile=row_tile, vocab_tile=vocab_tile,
                                  num_partitions=p_parts, budget=budget,
                                  vmem_limit=vmem_limit, row_cap=row_cap)

    num = jnp.sum(acc[:, 0, 0])
    den = jnp.sum((labels != ignore_index).astype(jnp.float32))  # tiny host-side op
    # loss = -sum(x * mask) / sum(mask); 0 if no unmasked tokens.
    return jnp.where(den == 0, jnp.float32(0.0), -num / den)


# --------------------------------------------------------------------------
# Plain-JAX reference mirroring the PyTorch module
# --------------------------------------------------------------------------
def _reference_loss(student_chunks, teacher_chunks, labels,
                    num_output_chunks, ignore_index):
    vocab = student_chunks[0].shape[-1]
    total = jnp.float32(0.0)
    label_chunks = jnp.split(labels, num_output_chunks, axis=1)
    for sc, tc, lc in zip(student_chunks, teacher_chunks, label_chunks):
        s = sc.reshape(-1, vocab).astype(jnp.float32)
        t = tc.reshape(-1, vocab).astype(jnp.float32)
        s_prob = jax.nn.softmax(s, axis=-1)
        s_lp = jax.nn.log_softmax(s, axis=-1)
        t_lp = jax.nn.log_softmax(t, axis=-1)
        inf_mask = jnp.isinf(s) | jnp.isinf(t)
        prod = jnp.where(inf_mask, 0.0, s_prob * t_lp)
        prod = prod - jnp.where(inf_mask, 0.0, s_prob * s_lp)
        x = jnp.sum(prod, axis=-1)
        m = (lc.reshape(-1) != ignore_index).astype(jnp.float32)
        total = total + (-jnp.sum(x * m))
    den = jnp.sum((labels != ignore_index).astype(jnp.float32))
    return jnp.where(den == 0, jnp.float32(0.0), total / den)


# --------------------------------------------------------------------------
# Self-test
# --------------------------------------------------------------------------
if __name__ == "__main__":
    def run_case(bsz, num_tokens, vocab, num_output_chunks, seed, *,
                 row_tile=None, vocab_tile=None, num_partitions=2):
        ignore_index = -100
        tpc = num_tokens // num_output_chunks
        key = jax.random.fold_in(jax.random.PRNGKey(0), seed)
        ks, kt, kl = jax.random.split(key, 3)
        student = (jax.random.normal(ks, (bsz, num_tokens, vocab), jnp.float32)
                   .astype(jnp.bfloat16))
        teacher = (jax.random.normal(kt, (bsz, num_tokens, vocab), jnp.float32)
                   .astype(jnp.bfloat16))
        labels = jax.random.randint(kl, (bsz, num_tokens), 0, vocab, jnp.int32)
        labels = labels.at[0, :3].set(ignore_index)
        labels = labels.at[1, -2:].set(ignore_index)

        s_chunks = [student[:, c * tpc:(c + 1) * tpc, :]
                    for c in range(num_output_chunks)]
        t_chunks = [teacher[:, c * tpc:(c + 1) * tpc, :]
                    for c in range(num_output_chunks)]

        loss = reverse_kl_chunked_loss(s_chunks, t_chunks, labels,
                                       ignore_index=ignore_index,
                                       row_tile=row_tile, vocab_tile=vocab_tile,
                                       num_partitions=num_partitions)
        loss = jax.block_until_ready(loss)
        ref = jax.block_until_ready(
            _reference_loss(s_chunks, t_chunks, labels,
                            num_output_chunks, ignore_index))
        np.testing.assert_allclose(np.asarray(loss), np.asarray(ref),
                                   rtol=1e-4, atol=1e-5)

    # (a) auto tiles: 16 rows/chunk, full 512-wide vocab tile, 2 partitions
    #     (partition 1 is a pure overrun block -> exercises the row mask and
    #      the cross-chunk input_output_aliases accumulation over 8 chunks).
    run_case(2, 64, 512, 8, 0)
    # (b) forced small tiles: 36 rows/chunk with row_tile=16 (partial last row
    #     block + overrun step), vocab_tile=256 (online-softmax rescale path).
    run_case(2, 72, 512, 4, 1, row_tile=16, vocab_tile=256)
    # (c) vocab_tile that does not divide vocab (384 % 256 != 0) ->
    #     padding-column (-inf poison) mask path.
    run_case(2, 32, 384, 4, 2, vocab_tile=256)

    print("KERNEL_OK")
</pallas_src>

<mosaic_0001>
module attributes {stable_mosaic.version = 11 : i64} {
  func.func @_rkl_kernel(%arg0: i32, %arg1: i32, %arg2: i32, %arg3: memref<1x1x128xf32, #tpu.memory_space<vmem>>, %arg4: memref<16x1xi32, #tpu.memory_space<vmem>>, %arg5: memref<16x512xbf16, #tpu.memory_space<vmem>>, %arg6: memref<16x512xbf16, #tpu.memory_space<vmem>>, %arg7: memref<1x1x128xf32, #tpu.memory_space<vmem>>, %arg8: memref<16x1xf32, #tpu.memory_space<vmem>>, %arg9: memref<16x1xf32, #tpu.memory_space<vmem>>, %arg10: memref<16x1xf32, #tpu.memory_space<vmem>>, %arg11: memref<16x1xf32, #tpu.memory_space<vmem>>, %arg12: memref<16x1xf32, #tpu.memory_space<vmem>>, %arg13: memref<16x1xf32, #tpu.memory_space<vmem>>, %arg14: memref<16x1xf32, #tpu.memory_space<vmem>>) attributes {dimension_semantics = [#tpu.dimension_semantics<parallel>, #tpu.dimension_semantics<arbitrary>, #tpu.dimension_semantics<arbitrary>], iteration_bounds = array<i64: 2, 1, 1>, scalar_prefetch = 0 : i64, scratch_operands = 7 : i64, tpu.core_type = #tpu.core_type<tc>, window_params = [{transform_indices = @transform_0, window_bounds = array<i64: 1, 1, 128>}, {transform_indices = @transform_1, window_bounds = array<i64: 16, 1>}, {transform_indices = @transform_2, window_bounds = array<i64: 16, 512>}, {transform_indices = @transform_3, window_bounds = array<i64: 16, 512>}, {transform_indices = @transform_4, window_bounds = array<i64: 1, 1, 128>}]} {
    %cst = arith.constant 0.000000e+00 : f32
    %0 = vector.broadcast %cst : f32 to vector<16x1xf32>
    %cst_0 = arith.constant 0xFF800000 : f32
    %1 = vector.broadcast %cst_0 : f32 to vector<16x1xf32>
    %c0_i32 = arith.constant 0 : i32
    %2 = arith.cmpi eq, %arg1, %c0_i32 : i32
    %c0_i32_1 = arith.constant 0 : i32
    %3 = arith.cmpi eq, %arg2, %c0_i32_1 : i32
    %4 = arith.andi %2, %3 : i1
    %5 = arith.extui %4 : i1 to i32
    %c0_i32_2 = arith.constant 0 : i32
    %6 = arith.cmpi ne, %5, %c0_i32_2 : i32
    scf.if %6 {
      %c0_47 = arith.constant 0 : index
      %c0_48 = arith.constant 0 : index
      %81 = vector.load %arg8[%c0_47, %c0_48] : memref<16x1xf32, #tpu.memory_space<vmem>>, vector<16x1xf32>
      tpu.vector_store %arg8[%c0_47, %c0_48], %0 {strides = array<i32>} : memref<16x1xf32, #tpu.memory_space<vmem>>, vector<16x1xf32>,
    } else {
    }
    %c0_i32_3 = arith.constant 0 : i32
    %7 = arith.cmpi eq, %arg2, %c0_i32_3 : i32
    %8 = arith.extui %7 : i1 to i32
    %c0_i32_4 = arith.constant 0 : i32
    %9 = arith.cmpi ne, %8, %c0_i32_4 : i32
    scf.if %9 {
      %c0_47 = arith.constant 0 : index
      %c0_48 = arith.constant 0 : index
      %81 = vector.load %arg9[%c0_47, %c0_48] : memref<16x1xf32, #tpu.memory_space<vmem>>, vector<16x1xf32>
      tpu.vector_store %arg9[%c0_47, %c0_48], %1 {strides = array<i32>} : memref<16x1xf32, #tpu.memory_space<vmem>>, vector<16x1xf32>,
      %c0_49 = arith.constant 0 : index
      %c0_50 = arith.constant 0 : index
      %82 = vector.load %arg13[%c0_49, %c0_50] : memref<16x1xf32, #tpu.memory_space<vmem>>, vector<16x1xf32>
      tpu.vector_store %arg13[%c0_49, %c0_50], %1 {strides = array<i32>} : memref<16x1xf32, #tpu.memory_space<vmem>>, vector<16x1xf32>,
      %c0_51 = arith.constant 0 : index
      %c0_52 = arith.constant 0 : index
      %83 = vector.load %arg10[%c0_51, %c0_52] : memref<16x1xf32, #tpu.memory_space<vmem>>, vector<16x1xf32>
      tpu.vector_store %arg10[%c0_51, %c0_52], %0 {strides = array<i32>} : memref<16x1xf32, #tpu.memory_space<vmem>>, vector<16x1xf32>,
      %c0_53 = arith.constant 0 : index
      %c0_54 = arith.constant 0 : index
      %84 = vector.load %arg14[%c0_53, %c0_54] : memref<16x1xf32, #tpu.memory_space<vmem>>, vector<16x1xf32>
      tpu.vector_store %arg14[%c0_53, %c0_54], %0 {strides = array<i32>} : memref<16x1xf32, #tpu.memory_space<vmem>>, vector<16x1xf32>,
      %c0_55 = arith.constant 0 : index
      %c0_56 = arith.constant 0 : index
      %85 = vector.load %arg11[%c0_55, %c0_56] : memref<16x1xf32, #tpu.memory_space<vmem>>, vector<16x1xf32>
      tpu.vector_store %arg11[%c0_55, %c0_56], %0 {strides = array<i32>} : memref<16x1xf32, #tpu.memory_space<vmem>>, vector<16x1xf32>,
      %c0_57 = arith.constant 0 : index
      %c0_58 = arith.constant 0 : index
      %86 = vector.load %arg12[%c0_57, %c0_58] : memref<16x1xf32, #tpu.memory_space<vmem>>, vector<16x1xf32>
      tpu.vector_store %arg12[%c0_57, %c0_58], %0 {strides = array<i32>} : memref<16x1xf32, #tpu.memory_space<vmem>>, vector<16x1xf32>,
    } else {
    }
    %c0 = arith.constant 0 : index
    %c0_5 = arith.constant 0 : index
    %10 = vector.load %arg5[%c0, %c0_5] : memref<16x512xbf16, #tpu.memory_space<vmem>>, vector<16x512xbf16>
    %c0_6 = arith.constant 0 : index
    %c0_7 = arith.constant 0 : index
    %11 = vector.load %arg6[%c0_6, %c0_7] : memref<16x512xbf16, #tpu.memory_space<vmem>>, vector<16x512xbf16>
    %12 = math.absf %10 : vector<16x512xbf16>
    %cst_8 = arith.constant 0x7F80 : bf16
    %13 = vector.broadcast %cst_8 : bf16 to vector<16x512xbf16>
    %14 = arith.cmpf oeq, %12, %13 : vector<16x512xbf16>
    %15 = math.absf %11 : vector<16x512xbf16>
    %cst_9 = arith.constant 0x7F80 : bf16
    %16 = vector.broadcast %cst_9 : bf16 to vector<16x512xbf16>
    %17 = arith.cmpf oeq, %15, %16 : vector<16x512xbf16>
    %18 = arith.ori %14, %17 : vector<16x512xi1>
    %cst_10 = arith.constant dense<0xFF80> : vector<16xbf16>
    %19 = vector.multi_reduction <maximumf>, %10, %cst_10 [1] : vector<16x512xbf16> to vector<16xbf16>
    %20 = vector.shape_cast %19 : vector<16xbf16> to vector<16x1xbf16>
    %21 = arith.extf %20 : vector<16x1xbf16> to vector<16x1xf32>
    %cst_11 = arith.constant dense<0xFF80> : vector<16xbf16>
    %22 = vector.multi_reduction <maximumf>, %11, %cst_11 [1] : vector<16x512xbf16> to vector<16xbf16>
    %23 = vector.shape_cast %22 : vector<16xbf16> to vector<16x1xbf16>
    %24 = arith.extf %23 : vector<16x1xbf16> to vector<16x1xf32>
    %25 = arith.extf %10 : vector<16x512xbf16> to vector<16x512xf32>
    %26 = arith.extf %11 : vector<16x512xbf16> to vector<16x512xf32>
    %c0_12 = arith.constant 0 : index
    %c0_13 = arith.constant 0 : index
    %27 = vector.load %arg9[%c0_12, %c0_13] : memref<16x1xf32, #tpu.memory_space<vmem>>, vector<16x1xf32>
    %28 = arith.maximumf %27, %21 : vector<16x1xf32>
    %29 = arith.subf %27, %28 : vector<16x1xf32>
    %30 = math.exp %29 : vector<16x1xf32>
    %31 = vector.broadcast %28 : vector<16x1xf32> to vector<16x512xf32>
    %32 = arith.subf %25, %31 : vector<16x512xf32>
    %33 = math.exp %32 : vector<16x512xf32>
    %34 = arith.subf %26, %25 : vector<16x512xf32>
    %35 = arith.mulf %33, %34 : vector<16x512xf32>
    %cst_14 = arith.constant 0.000000e+00 : f32
    %36 = vector.broadcast %cst_14 : f32 to vector<16x512xf32>
    %37 = arith.select %18, %36, %35 : vector<16x512xi1>, vector<16x512xf32>
    %cst_15 = arith.constant 0.000000e+00 : f32
    %38 = vector.broadcast %cst_15 : f32 to vector<16x512xf32>
    %39 = arith.select %18, %38, %33 : vector<16x512xi1>, vector<16x512xf32>
    %c0_16 = arith.constant 0 : index
    %c0_17 = arith.constant 0 : index
    %40 = vector.load %arg10[%c0_16, %c0_17] : memref<16x1xf32, #tpu.memory_space<vmem>>, vector<16x1xf32>
    %41 = arith.mulf %30, %40 : vector<16x1xf32>
    %cst_18 = arith.constant dense<0.000000e+00> : vector<16xf32>
    %42 = vector.multi_reduction <add>, %33, %cst_18 [1] : vector<16x512xf32> to vector<16xf32>
    %43 = vector.shape_cast %42 : vector<16xf32> to vector<16x1xf32>
    %44 = arith.addf %41, %43 : vector<16x1xf32>
    %c0_19 = arith.constant 0 : index
    %c0_20 = arith.constant 0 : index
    %45 = vector.load %arg10[%c0_19, %c0_20] : memref<16x1xf32, #tpu.memory_space<vmem>>, vector<16x1xf32>
    tpu.vector_store %arg10[%c0_19, %c0_20], %44 {strides = array<i32>} : memref<16x1xf32, #tpu.memory_space<vmem>>, vector<16x1xf32>,
    %c0_21 = arith.constant 0 : index
    %c0_22 = arith.constant 0 : index
    %46 = vector.load %arg11[%c0_21, %c0_22] : memref<16x1xf32, #tpu.memory_space<vmem>>, vector<16x1xf32>
    %47 = arith.mulf %30, %46 : vector<16x1xf32>
    %cst_23 = arith.constant dense<0.000000e+00> : vector<16xf32>
    %48 = vector.multi_reduction <add>, %37, %cst_23 [1] : vector<16x512xf32> to vector<16xf32>
    %49 = vector.shape_cast %48 : vector<16xf32> to vector<16x1xf32>
    %50 = arith.addf %47, %49 : vector<16x1xf32>
    %c0_24 = arith.constant 0 : index
    %c0_25 = arith.constant 0 : index
    %51 = vector.load %arg11[%c0_24, %c0_25] : memref<16x1xf32, #tpu.memory_space<vmem>>, vector<16x1xf32>
    tpu.vector_store %arg11[%c0_24, %c0_25], %50 {strides = array<i32>} : memref<16x1xf32, #tpu.memory_space<vmem>>, vector<16x1xf32>,
    %c0_26 = arith.constant 0 : index
    %c0_27 = arith.constant 0 : index
    %52 = vector.load %arg12[%c0_26, %c0_27] : memref<16x1xf32, #tpu.memory_space<vmem>>, vector<16x1xf32>
    %53 = arith.mulf %30, %52 : vector<16x1xf32>
    %cst_28 = arith.constant dense<0.000000e+00> : vector<16xf32>
    %54 = vector.multi_reduction <add>, %39, %cst_28 [1] : vector<16x512xf32> to vector<16xf32>
    %55 = vector.shape_cast %54 : vector<16xf32> to vector<16x1xf32>
    %56 = arith.addf %53, %55 : vector<16x1xf32>
    %c0_29 = arith.constant 0 : index
    %c0_30 = arith.constant 0 : index
    %57 = vector.load %arg12[%c0_29, %c0_30] : memref<16x1xf32, #tpu.memory_space<vmem>>, vector<16x1xf32>
    tpu.vector_store %arg12[%c0_29, %c0_30], %56 {strides = array<i32>} : memref<16x1xf32, #tpu.memory_space<vmem>>, vector<16x1xf32>,
    %c0_31 = arith.constant 0 : index
    %c0_32 = arith.constant 0 : index
    %58 = vector.load %arg9[%c0_31, %c0_32] : memref<16x1xf32, #tpu.memory_space<vmem>>, vector<16x1xf32>
    tpu.vector_store %arg9[%c0_31, %c0_32], %28 {strides = array<i32>} : memref<16x1xf32, #tpu.memory_space<vmem>>, vector<16x1xf32>,
    %c0_33 = arith.constant 0 : index
    %c0_34 = arith.constant 0 : index
    %59 = vector.load %arg13[%c0_33, %c0_34] : memref<16x1xf32, #tpu.memory_space<vmem>>, vector<16x1xf32>
    %60 = arith.maximumf %59, %24 : vector<16x1xf32>
    %61 = arith.subf %59, %60 : vector<16x1xf32>
    %62 = math.exp %61 : vector<16x1xf32>
    %c0_35 = arith.constant 0 : index
    %c0_36 = arith.constant 0 : index
    %63 = vector.load %arg14[%c0_35, %c0_36] : memref<16x1xf32, #tpu.memory_space<vmem>>, vector<16x1xf32>
    %64 = arith.mulf %62, %63 : vector<16x1xf32>
    %65 = vector.broadcast %60 : vector<16x1xf32> to vector<16x512xf32>
    %66 = arith.subf %26, %65 : vector<16x512xf32>
    %67 = math.exp %66 : vector<16x512xf32>
    %cst_37 = arith.constant dense<0.000000e+00> : vector<16xf32>
    %68 = vector.multi_reduction <add>, %67, %cst_37 [1] : vector<16x512xf32> to vector<16xf32>
    %69 = vector.shape_cast %68 : vector<16xf32> to vector<16x1xf32>
    %70 = arith.addf %64, %69 : vector<16x1xf32>
    %c0_38 = arith.constant 0 : index
    %c0_39 = arith.constant 0 : index
    %71 = vector.load %arg14[%c0_38, %c0_39] : memref<16x1xf32, #tpu.memory_space<vmem>>, vector<16x1xf32>
    tpu.vector_store %arg14[%c0_38, %c0_39], %70 {strides = array<i32>} : memref<16x1xf32, #tpu.memory_space<vmem>>, vector<16x1xf32>,
    %c0_40 = arith.constant 0 : index
    %c0_41 = arith.constant 0 : index
    %72 = vector.load %arg13[%c0_40, %c0_41] : memref<16x1xf32, #tpu.memory_space<vmem>>, vector<16x1xf32>
    tpu.vector_store %arg13[%c0_40, %c0_41], %60 {strides = array<i32>} : memref<16x1xf32, #tpu.memory_space<vmem>>, vector<16x1xf32>,
    %c0_i32_42 = arith.constant 0 : i32
    %73 = arith.cmpi eq, %arg2, %c0_i32_42 : i32
    %74 = arith.extui %73 : i1 to i32
    %c0_i32_43 = arith.constant 0 : i32
    %75 = arith.cmpi ne, %74, %c0_i32_43 : i32
    scf.if %75 {
      %c0_47 = arith.constant 0 : index
      %c0_48 = arith.constant 0 : index
      %81 = vector.load %arg13[%c0_47, %c0_48] : memref<16x1xf32, #tpu.memory_space<vmem>>, vector<16x1xf32>
      %c0_49 = arith.constant 0 : index
      %c0_50 = arith.constant 0 : index
      %82 = vector.load %arg14[%c0_49, %c0_50] : memref<16x1xf32, #tpu.memory_space<vmem>>, vector<16x1xf32>
      %83 = math.log %82 : vector<16x1xf32>
      %84 = arith.addf %81, %83 : vector<16x1xf32>
      %c0_51 = arith.constant 0 : index
      %c0_52 = arith.constant 0 : index
      %85 = vector.load %arg9[%c0_51, %c0_52] : memref<16x1xf32, #tpu.memory_space<vmem>>, vector<16x1xf32>
      %c0_53 = arith.constant 0 : index
      %c0_54 = arith.constant 0 : index
      %86 = vector.load %arg10[%c0_53, %c0_54] : memref<16x1xf32, #tpu.memory_space<vmem>>, vector<16x1xf32>
      %87 = math.log %86 : vector<16x1xf32>
      %88 = arith.addf %85, %87 : vector<16x1xf32>
      %89 = arith.subf %84, %88 : vector<16x1xf32>
      %c0_55 = arith.constant 0 : index
      %c0_56 = arith.constant 0 : index
      %90 = vector.load %arg11[%c0_55, %c0_56] : memref<16x1xf32, #tpu.memory_space<vmem>>, vector<16x1xf32>
      %c0_57 = arith.constant 0 : index
      %c0_58 = arith.constant 0 : index
      %91 = vector.load %arg12[%c0_57, %c0_58] : memref<16x1xf32, #tpu.memory_space<vmem>>, vector<16x1xf32>
      %92 = arith.mulf %89, %91 : vector<16x1xf32>
      %93 = arith.subf %90, %92 : vector<16x1xf32>
      %c0_59 = arith.constant 0 : index
      %c0_60 = arith.constant 0 : index
      %94 = vector.load %arg10[%c0_59, %c0_60] : memref<16x1xf32, #tpu.memory_space<vmem>>, vector<16x1xf32>
      %95 = arith.divf %93, %94 : vector<16x1xf32>
      %c0_61 = arith.constant 0 : index
      %c0_62 = arith.constant 0 : index
      %96 = vector.load %arg4[%c0_61, %c0_62] : memref<16x1xi32, #tpu.memory_space<vmem>>, vector<16x1xi32>
      %c-100_i32 = arith.constant -100 : i32
      %97 = vector.broadcast %c-100_i32 : i32 to vector<16x1xi32>
      %98 = arith.cmpi ne, %96, %97 : vector<16x1xi32>
      %c1_i32 = arith.constant 1 : i32
      %99 = arith.muli %arg0, %c1_i32 : i32
      %100 = arith.addi %99, %arg1 : i32
      %c16_i32 = arith.constant 16 : i32
      %101 = arith.muli %100, %c16_i32 : i32
      %102 = tpu.iota {dimensions = array<i32: 0>} : vector<16x1xi32>
      %103 = vector.broadcast %101 : i32 to vector<16x1xi32>
      %104 = arith.addi %103, %102 : vector<16x1xi32>
      %c16_i32_63 = arith.constant 16 : i32
      %105 = vector.broadcast %c16_i32_63 : i32 to vector<16x1xi32>
      %106 = arith.cmpi slt, %104, %105 : vector<16x1xi32>
      %107 = arith.andi %98, %106 : vector<16x1xi1>
      %c0_64 = arith.constant 0 : index
      %c0_65 = arith.constant 0 : index
      %108 = vector.load %arg8[%c0_64, %c0_65] : memref<16x1xf32, #tpu.memory_space<vmem>>, vector<16x1xf32>
      %cst_66 = arith.constant 0.000000e+00 : f32
      %109 = vector.broadcast %cst_66 : f32 to vector<16x1xf32>
      %110 = arith.select %107, %95, %109 : vector<16x1xi1>, vector<16x1xf32>
      %111 = arith.addf %108, %110 : vector<16x1xf32>
      %c0_67 = arith.constant 0 : index
      %c0_68 = arith.constant 0 : index
      %112 = vector.load %arg8[%c0_67, %c0_68] : memref<16x1xf32, #tpu.memory_space<vmem>>, vector<16x1xf32>
      tpu.vector_store %arg8[%c0_67, %c0_68], %111 {strides = array<i32>} : memref<16x1xf32, #tpu.memory_space<vmem>>, vector<16x1xf32>,
    } else {
    }
    %c0_i32_44 = arith.constant 0 : i32
    %76 = arith.cmpi eq, %arg2, %c0_i32_44 : i32
    %c0_i32_45 = arith.constant 0 : i32
    %77 = arith.cmpi eq, %arg1, %c0_i32_45 : i32
    %78 = arith.andi %76, %77 : i1
    %79 = arith.extui %78 : i1 to i32
    %c0_i32_46 = arith.constant 0 : i32
    %80 = arith.cmpi ne, %79, %c0_i32_46 : i32
    scf.if %80 {
      %c0_47 = arith.constant 0 : index
      %c0_48 = arith.constant 0 : index
      %c0_49 = arith.constant 0 : index
      %81 = vector.load %arg3[%c0_47, %c0_48, %c0_49] : memref<1x1x128xf32, #tpu.memory_space<vmem>>, vector<1x1x128xf32>
      %c0_50 = arith.constant 0 : index
      %c0_51 = arith.constant 0 : index
      %82 = vector.load %arg8[%c0_50, %c0_51] : memref<16x1xf32, #tpu.memory_space<vmem>>, vector<16x1xf32>
      %83 = vector.shape_cast %82 : vector<16x1xf32> to vector<1x16x1xf32>
      %cst_52 = arith.constant dense<0.000000e+00> : vector<1xf32>
      %84 = vector.multi_reduction <add>, %83, %cst_52 [1, 2] : vector<1x16x1xf32> to vector<1xf32>
      %85 = vector.shape_cast %84 : vector<1xf32> to vector<1x1x1xf32>
      %86 = vector.extract %85[0, 0, 0] : f32 from vector<1x1x1xf32>
      %87 = vector.broadcast %86 : f32 to vector<1x1x128xf32>
      %88 = arith.addf %81, %87 : vector<1x1x128xf32>
      %c0_53 = arith.constant 0 : index
      %c0_54 = arith.constant 0 : index
      %c0_55 = arith.constant 0 : index
      %89 = vector.load %arg7[%c0_53, %c0_54, %c0_55] : memref<1x1x128xf32, #tpu.memory_space<vmem>>, vector<1x1x128xf32>
      tpu.vector_store %arg7[%c0_53, %c0_54, %c0_55], %88 {strides = array<i32>} : memref<1x1x128xf32, #tpu.memory_space<vmem>>, vector<1x1x128xf32>,
    } else {
    }
    return
  }
  func.func @transform_0(%arg0: i32, %arg1: i32, %arg2: i32) -> (i32, i32, i32) {
    %c0_i32 = arith.constant 0 : i32
    %c0_i32_0 = arith.constant 0 : i32
    %c0_i32_1 = arith.constant 0 : i32
    return %arg0, %c0_i32, %c0_i32_0 : i32, i32, i32
  }
  func.func @transform_1(%arg0: i32, %arg1: i32, %arg2: i32) -> (i32, i32) {
    %c1_i32 = arith.constant 1 : i32
    %0 = arith.muli %arg0, %c1_i32 : i32
    %1 = arith.addi %0, %arg1 : i32
    %c0_i32 = arith.constant 0 : i32
    %2 = arith.minsi %1, %c0_i32 : i32
    %c0_i32_0 = arith.constant 0 : i32
    %c0_i32_1 = arith.constant 0 : i32
    return %2, %c0_i32_0 : i32, i32
  }
  func.func @transform_2(%arg0: i32, %arg1: i32, %arg2: i32) -> (i32, i32) {
    %c1_i32 = arith.constant 1 : i32
    %0 = arith.muli %arg0, %c1_i32 : i32
    %1 = arith.addi %0, %arg1 : i32
    %c0_i32 = arith.constant 0 : i32
    %2 = arith.minsi %1, %c0_i32 : i32
    %c0_i32_0 = arith.constant 0 : i32
    return %2, %arg2 : i32, i32
  }
  func.func @transform_3(%arg0: i32, %arg1: i32, %arg2: i32) -> (i32, i32) {
    %c1_i32 = arith.constant 1 : i32
    %0 = arith.muli %arg0, %c1_i32 : i32
    %1 = arith.addi %0, %arg1 : i32
    %c0_i32 = arith.constant 0 : i32
    %2 = arith.minsi %1, %c0_i32 : i32
    %c0_i32_0 = arith.constant 0 : i32
    return %2, %arg2 : i32, i32
  }
  func.func @transform_4(%arg0: i32, %arg1: i32, %arg2: i32) -> (i32, i32, i32) {
    %c0_i32 = arith.constant 0 : i32
    %c0_i32_0 = arith.constant 0 : i32
    %c0_i32_1 = arith.constant 0 : i32
    return %arg0, %c0_i32, %c0_i32_0 : i32, i32, i32
  }
}

</mosaic_0001>

<bundles_post_ra>
// kernel: tpu_custom_call.1
= control target key start
LH: loop header
LB: loop body
LE: loop exit
PB: predicated region body
PF: predicated region fallthrough
CT: control target
= control target key end

     0   :  { %9 = vsyncpa [#allocation10], 0  ;;  %s1962_s0 = inlined_call_operand.hbm [shape: f32[2,1,128], index: 0, kind: input, shape index: {}, may-alias: {0,4}]   ;;  %s1963_s1 = inlined_call_operand.vmem [shape: s32[16,1], index: 1, kind: input, shape index: {}]   ;;  %s1964_s2 = inlined_call_operand.hbm [shape: bf16[16,512], index: 2, kind: input, shape index: {}]   ;;  %s1965_s3 = inlined_call_operand.vmem [shape: bf16[16,512], index: 3, kind: input, shape index: {}]   ;;  %s1966_s4 = inlined_call_operand.hbm [shape: f32[2,1,128], index: 4, kind: output, shape index: {}, may-alias: {0,4}]  }
   0x1   :  { %11 = vsyncpa [#allocation10 + $0x1], 0 }
   0x2   :  { %12 = vsyncpa [#allocation13], 0 }
   0x3   :  { %14 = vsyncpa [#allocation13 + $0x1], 0 }
   0x4   :  { %15 = vsyncpa [#allocation11], 0 }
   0x5   :  { %17 = vsyncpa [#allocation11 + $0x1], 0  ;;  %s1352_s15 = smov 0   ;;  %s1354_s16 = smov 0  }
   0x6   :  { %s1356_s17 = smov 0   ;;  %s1358_s18 = smov 0  }
   0x7   :  { %s1360_s19 = smov 0   ;;  %s1362_s20 = smov 0  }
   0x8   :  { %s1364_s21 = smov 0   ;;  %s1366_s22 = smov 0  }
   0x9 LB: > { %s959_s23 = sadd.s32 4294967295, %s1317_s22   ;;  %s960_s24 = sadd.s32 4294967294, %s1317_s22   ;;  %s1317_s22 = sphi %s1366_s22, %s23_s22   ;;  %s1313_s21 = sphi %s1364_s21, %s2028_s21   ;;  %s1309_s20 = sphi %s1362_s20, %s2027_s20   ;;  %s1305_s19 = sphi %s1360_s19, %s2026_s19   ;;  %s1301_s18 = sphi %s1358_s18, %s2025_s18   ;;  %s1297_s17 = sphi %s1356_s17, %s2024_s17   ;;  %s1293_s16 = sphi %s1354_s16, %s1943_s16   ;;  %s1289_s15 = sphi %s1352_s15, %s2023_s15  }
   0xa   : > { %s42_s25 = sadd.s32 1, %s1313_s21  ;;  %s49_s26 = sadd.s32 1, %s1305_s19 }
   0xb   : > { %p44_p0 = scmp.ge.s32.totalorder %s42_s25, 2  ;;  %p56_p1 = scmp.ne.s32.totalorder %s1305_s19, %s1301_s18 }
   0xc   : > { %p57_p2 = scmp.eq.s32.totalorder %s1317_s22, 0  ;;  %p1967_p3 = scmp.ne.s32.totalorder %s1301_s18, %s1297_s17 }
   0xd   : > { %s2030_s25 = smov (%p44_p0, %s42_s25), 0  ;;  %p63_p5 = scmp.eq.s32.totalorder %s959_s23, 0 }
   0xe   : > { %p1404_p4 = por %p57_p2, %p56_p1  ;;  %s46_s28 = ssub.s32 %s1313_s21, %s2030_s25 }
   0xf   : > { %p1286_p6 = scmp.ne.s32.totalorder %s1293_s16, 0  ;;  %p47_p7 = scmp.eq.s32.totalorder %s46_s28, 0 }
  0x10   : > { %p1414_p8 = por %p63_p5, %p1967_p3  ;;  %p128_p10 = scmp.ne.s32.totalorder %s1293_s16, %s1289_s15 }
  0x11   : > { %p1418_p9 = por %p1286_p6, %p57_p2  ;;  %p186_p12 = scmp.eq.s32.totalorder %s959_s23, 1 }
  0x12   : > { %s1973_s29 = scalar_select %p1414_p8, 1, 0 }
  0x13   : > { %s1424_s5 = scalar_select %p47_p7, %s1305_s19, %s49_s26  }
  0x14   : > { %p1426_p11 = por %p128_p10, %p63_p5  ;;  %p192_p13 = scmp.eq.s32.totalorder %s960_s24, 1 }
  0x15   : > { %p1434_p3 = por %p186_p12, %p56_p1  ;;  %p1009_p2 = scmp.lt.s32.totalorder %s1317_s22, 2 }
  0x16   : > { %s1975_s6 = scalar_select %p1426_p11, 1, 0 }
  0x17   : > { %s1976_s7 = scalar_select %p1434_p3, 1, 0 }
  0x18   : > { %p1977_p6 = scmp.ne.s32.totalorder %s1301_s18, %s1297_s17  ;;  %s212_s9 = sand.u32 1, %s1305_s19  }
  0x19   : > { %s963_s10 = sshll.u32 %s1313_s21, 4  ;;  %s215_s11 = scalar_lea.vmem [#allocation9], %s212_s9 }
  0x1a   : > { %p1442_p8 = por %p192_p13, %p1977_p6  ;;  %s222_s12 = sshll.u32 %s215_s11, 4  ;;  %s1453_s12 = int_to_ptr.vmem [resolvable:$true] %s222_s12 }
  0x1b   : > { %s1451_s15 = scalar_lea.hbm %s1962_s0, %s963_s10  ;;  %p1457_p1 = pnand %p1009_p2, %p1404_p4 }
  0x1c   : > { %s1978_s8 = scalar_select %p1442_p8, 1, 0 }
  0x1d   : > { %p1463_p5 = pnand %p1009_p2, %p1418_p9  ;;  %s213_s26 = scalar_lea.sflag [#allocation10], %s212_s9 }
  0x1e   : > { %s1150_s28 = scalar_lea.hbm %s1451_s15, 16  ;;  %p1152_p13 = pneg %p1457_p1 }
  0x1f   : > { %s1980_s24 = scalar_select %p1463_p5, 1, 0 }
  0x20   : > { %p1151_p12 = scmp.ne.s32.totalorder %s1451_s15, %s1150_s28  ;;  %s1155_s30 = scalar_lea.hbm %s1962_s0, 32 }
  0x21   : > { %p1156_p9 = scmp.lt.u32.totalorder %s1451_s15, %s1962_s0  ;;  %p1157_p2 = scmp.lt.u32.totalorder %s1155_s30, %s1150_s28 }
  0x22   : > { %p1153_p4 = pnand %p1152_p13, %p1151_p12  ;;  %p1159_p7 = scmp.lt.u32.totalorder %s1150_s28, %s1451_s15 }
  0x23   : > { %p1158_p0 = por %p1157_p2, %p1156_p9 }
  0x24   : > { %p1154_p6 = pneg %p1153_p4 }
  0x25   : > { %p1160_p10 = por %p1159_p7, %p1158_p0 }
  0x27   : > { %p1161_p8 = pnand %p1160_p10, %p1154_p6 }
  0x29   : > { %1164 = shalt.err (!%p1161_p8)
}
  0x2a   : > { %s1165_s9 = scalar_lea.vmem %s1453_s12, 16  ;;  %s1319_s14 = smov [#allocation9]  }
  0x2b   : > { %p1166_p12 = scmp.ne.s32.totalorder %s1453_s12, %s1165_s9  ;;  %s1170_s27 = sshll.u32 %s1319_s14, 4  ;;  %s1171_s27 = int_to_ptr.vmem [resolvable:$false] %s1170_s27 }
  0x2c   : > { %s1172_s10 = scalar_lea.vmem %s1171_s27, 32  ;;  %p1173_p11 = scmp.lt.s32.totalorder %s1453_s12, %s1171_s27 }
  0x2d   : > { %p1168_p4 = pnand %p1166_p12, %p1152_p13  ;;  %p1174_p9 = scmp.lt.s32.totalorder %s1172_s10, %s1165_s9 }
  0x2f   : > { %p1169_p3 = pneg %p1168_p4  ;;  %p1175_p2 = por %p1174_p9, %p1173_p11 }
  0x31   : > { %p1176_p0 = pnand %p1175_p2, %p1169_p3 }
  0x33   : > { %1179 = shalt.err (!%p1176_p0)
}
  0x34   : > { %1001 = dma.hbm_to_vmem [thread:$0]  (!%p1457_p1), %s1451_s15, 16, %s1453_s12, %s213_s26  }
  0x35   : > { %p1981_p8 = scmp.lt.s32.totalorder %s1317_s22, 3  ;;  %p1982_p7 = scmp.ge.s32.totalorder %s1317_s22, 1 }
  0x36   : > { %s1320_s30 = smov [#allocation12]   ;;  %s1180_s14 = scalar_lea.hbm %s1964_s2, 512 }
  0x37   : > { %p1498_p10 = pnand %p1982_p7, %p1981_p8  ;;  %s261_s11 = sshll.u32 %s1320_s30, 4  ;;  %s262_s11 = int_to_ptr.vmem [resolvable:$true] %s261_s11 }
  0x38   : > { %p1181_p3 = scmp.ne.s32.totalorder %s1964_s2, %s1180_s14  ;;  %p1182_p11 = pneg %p1463_p5 }
  0x39   : > { %s1983_s28 = scalar_select %p1498_p10, 1, 0 }
  0x3a   : > { %p1183_p1 = pnand %p1182_p11, %p1181_p3  ;;  %p1187_p6 = scmp.lt.u32.totalorder %s1180_s14, %s1180_s14 }
  0x3b   : > { %p1189_p12 = scmp.lt.u32.totalorder %s1180_s14, %s1964_s2 }
  0x3c   : > { %p1184_p13 = pneg %p1183_p1 }
  0x3d   : > { %p1190_p4 = por %p1189_p12, %p1187_p6 }
  0x3f   : > { %p1191_p9 = pnand %p1190_p4, %p1184_p13 }
  0x41   : > { %1194 = shalt.err (!%p1191_p9)
}
  0x42   : > { %s1195_s26 = scalar_lea.vmem %s262_s11, 512  ;;  %s1202_s10 = scalar_lea.vmem %s262_s11, 1024 }
  0x43   : > { %p1196_p2 = scmp.ne.s32.totalorder %s262_s11, %s1195_s26  ;;  %p1203_p7 = scmp.lt.s32.totalorder %s262_s11, %s262_s11 }
  0x44   : > { %p1204_p10 = scmp.lt.s32.totalorder %s1202_s10, %s1195_s26 }
  0x45   : > { %p1198_p0 = pnand %p1196_p2, %p1182_p11 }
  0x46   : > { %p1205_p5 = por %p1204_p10, %p1203_p7 }
  0x47   : > { %p1199_p8 = pneg %p1198_p0 }
  0x49   : > { %p1206_p3 = pnand %p1205_p5, %p1199_p8 }
  0x4b   : > { %1209 = shalt.err (!%p1206_p3)
}
  0x4c   : > { %s1321_s30 = smov 256   ;;  %s1322_s13 = smov 16  }
  0x4d   : > { %p1984_p1 = scmp.ne.s32.totalorder %s1980_s24, 0  ;;  %p1985_p13 = scmp.ne.s32.totalorder %s1983_s28, 0 }
  0x4e   : > { %s1521_s14 = sand.u32 (!%p1985_p13), 1, %s1301_s18   ;;  %p1986_p5 = scmp.ne.s32.totalorder (!%p1985_p13), %s1973_s29, 0 }
  0x4f   : > { %1004 = dma.hbm_to_vmem [thread:$0]  (!%p1984_p1), %s1964_s2, 512, %s262_s11, [#allocation13], %s1321_s30, %s1321_s30, %s1322_s13  }
  0x50   : > { %294 = sbr.rel (%p1985_p13) target bundleno = 826 (0x33a), region = 36  ;;  %s297_s27 = scalar_lea.sflag (!%p1985_p13), [#allocation10], %s1521_s14 }
  0x51   : > { %s299_s12 = scalar_lea.vmem (!%p1985_p13), [#allocation9], %s1521_s14 }
  0x57   : > { %1275 = dma.done.wait (%p1986_p5), %s297_s27, 16  }
  0x58   : > { %1277 = vsyncadd (%p1986_p5), %s297_s27, 4294967280  ;;  %s304_s24 = sand.u32 1, %s1293_s16   ;;  %p1987_p10 = scmp.ne.s32.totalorder %s1975_s6, 0 }
  0x59   : > { %s969_s11 = sshll.u32 %s304_s24, 5  ;;  %s305_s15 = scalar_lea.sflag [#allocation13], %s304_s24 }
  0x5a   : > { %s308_s28 = scalar_lea.vmem [#allocation12], %s969_s11 }
  0x5b   : > { %1279 = dma.done.wait (%p1987_p10), %s305_s15, 512  }
  0x5c   : > { %1281 = vsyncadd (%p1987_p10), %s305_s15, 4294966784  ;;  %p358_p11 = scmp.lt.s32.totalorder %s1309_s20, 0  ;;  %vm401_vm0 = vcmask 7168   ;;  %v1323_v0 = vmov -inf   ;;  %v1540_v1 = vld [vmem:[%s308_s28] sm:$0xff]  ;;  %v1542_v2 = vld [vmem:[%s308_s28 + $0x8] sm:$0xff] }
  0x5d   : > { %408 = vst.msk [vmem:[#allocation3] sm:$0xff] %vm401_vm0, %v1323_v0  ;;  %409 = vst.msk [vmem:[#allocation3 + $0x8] sm:$0xff] %vm401_vm0, %v1323_v0  ;;  %v1544_v3 = vld [vmem:[%s308_s28 + $0x10] sm:$0xff]  ;;  %v1548_v4 = vld [vmem:[%s308_s28 + $0x18] sm:$0xff]  ;;  %v1324_v23 = vmov 0   ;;  %v1325_v24 = vmov 0.0   ;;  %v502_v43 = vunpack.c.l.bf16 %v1540_v1  ;;  %v503_v44 = vunpack.c.h.bf16 %v1540_v1 }
  0x5e   : > { %410 = vst.msk [vmem:[#allocation7] sm:$0xff] %vm401_vm0, %v1323_v0  ;;  %411 = vst.msk [vmem:[#allocation7 + $0x8] sm:$0xff] %vm401_vm0, %v1323_v0  ;;  %s359_s29 = scalar_select %p358_p11, %s1309_s20, 0  ;;  %v975_v5 = vcombine.low %v1540_v1, %v1544_v3  ;;  %v976_v6 = vcombine.high %v1540_v1, %v1544_v3  ;;  %v977_v7 = vcombine.low %v1542_v2, %v1548_v4  ;;  %1088 = vset.pattern.permute.xlu1 %v1324_v23 }
  0x5f   : > { %v978_v8 = vcombine.high %v1542_v2, %v1548_v4  ;;  %1089 = vset.pattern.permute.xlu0 %v1324_v23  ;;  %412 = vst.msk [vmem:[#allocation4] sm:$0xff] %vm401_vm0, %v1325_v24  ;;  %402 = vst.msk [vmem:[#allocation2] sm:$0xff] %vm401_vm0, %v1325_v24  ;;  %v504_v45 = vunpack.c.l.bf16 %v1542_v2  ;;  %v505_v46 = vunpack.c.h.bf16 %v1542_v2  ;;  %v506_v47 = vunpack.c.l.bf16 %v1544_v3  ;;  %s983_s9 = sshll.u32 %s1309_s20, 4  ;;  %s356_s15 = scalar_lea.vmem [#allocation14], %s1521_s14 }
  0x60   : > { %s970_s26 = sshll.u32 %s359_s29, 1  ;;  %v468_v9 = vmax.bf16 %v976_v6, %v975_v5  ;;  %403 = vst.msk [vmem:[#allocation2 + $0x8] sm:$0xff] %vm401_vm0, %v1325_v24  ;;  %413 = vst.msk [vmem:[#allocation4 + $0x8] sm:$0xff] %vm401_vm0, %v1325_v24  ;;  %v507_v48 = vunpack.c.h.bf16 %v1544_v3  ;;  %v508_v49 = vunpack.c.l.bf16 %v1548_v4  ;;  %v509_v50 = vunpack.c.h.bf16 %v1548_v4  ;;  %s829_s28 = sshll.u32 %s356_s15, 4  ;;  %s1910_s28 = int_to_ptr.vmem [resolvable:$true] %s829_s28 }
  0x61   : > { %p361_p6 = scmp.lt.s32.totalorder %s970_s26, 1  ;;  %v469_v10 = vmax.bf16 %v978_v8, %v977_v7  ;;  %414 = vst.msk [vmem:[#allocation8] sm:$0xff] %vm401_vm0, %v1325_v24  ;;  %415 = vst.msk [vmem:[#allocation8 + $0x8] sm:$0xff] %vm401_vm0, %v1325_v24  ;;  %v430_v54 = vand.u32 2147450879, %v1544_v3  ;;  %s1908_s10 = scalar_lea.hbm %s1966_s4, %s983_s9 }
  0x62   : > { %416 = vst.msk [vmem:[#allocation5] sm:$0xff] %vm401_vm0, %v1325_v24  ;;  %417 = vst.msk [vmem:[#allocation5 + $0x8] sm:$0xff] %vm401_vm0, %v1325_v24  ;;  %v431_v62 = vand.u32 2147450879, %v1548_v4  ;;  %s817_s30 = scalar_lea.sflag [#allocation11], %s1521_s14  ;;  %p2020_p4 = scmp.ne.s32.totalorder %s1976_s7, 0 }
  0x63   : > { %s2032_s26 = smov (!%p361_p6, %s970_s26), 1  ;;  %v470_v17 = vmax.bf16 %v469_v10, %v468_v9  ;;  %418 = vst.msk [vmem:[#allocation6] sm:$0xff] %vm401_vm0, %v1325_v24  ;;  %419 = vst.msk [vmem:[#allocation6 + $0x8] sm:$0xff] %vm401_vm0, %v1325_v24  ;;  %vm1656_vm1 = vcmp.eq.bf16.partialorder %v430_v54, 2139127680 }
  0x64   : > { %s989_s6 = sshll.u32 %s2032_s26, 4  ;;  %v1590_v26 = vld [vmem:[#allocation3] sm:$0xff]  ;;  %v1592_v27 = vld [vmem:[#allocation3 + $0x8] sm:$0xff]  ;;  %vm1672_vm3 = vcmp.eq.bf16.partialorder %v431_v62, 2139127680  ;;  %s971_s23 = sshll.u32 %s2032_s26, 3 }
  0x65   : > { %s386_s13 = scalar_lea.vmem %s1965_s3, %s989_s6  ;;  %471 = vmax.xlane.bf16.xlu0 %v470_v17  ;;  %v1609_v35 = vld [vmem:[#allocation7] sm:$0xff]  ;;  %v1611_v36 = vld [vmem:[#allocation7 + $0x8] sm:$0xff]  ;;  %s364_s11 = scalar_lea.vmem %s1963_s1, %s971_s23 }
  0x66   : > { %v1562_v11 = vld [vmem:[%s386_s13] sm:$0xff]  ;;  %v1564_v12 = vld [vmem:[%s386_s13 + $0x8] sm:$0xff]  ;;  %v1566_v13 = vld [vmem:[%s386_s13 + $0x10] sm:$0xff] }
  0x67   : > { %v1568_v14 = vld [vmem:[%s386_s13 + $0x18] sm:$0xff]  ;;  %v979_v15 = vcombine.low %v1562_v11, %v1566_v13  ;;  %v980_v16 = vcombine.high %v1562_v11, %v1566_v13  ;;  %v514_v52 = vunpack.c.l.bf16 %v1566_v13  ;;  %v515_v53 = vunpack.c.h.bf16 %v1566_v13  ;;  %s1210_s13 = scalar_lea.vmem %s1910_s28, 16 }
  0x68   : > { %v981_v18 = vcombine.low %v1564_v12, %v1568_v14  ;;  %v982_v19 = vcombine.high %v1564_v12, %v1568_v14  ;;  %v438_v55 = vand.u32 2147450879, %v1566_v13  ;;  %v516_v60 = vunpack.c.l.bf16 %v1568_v14  ;;  %p1211_p12 = scmp.ne.s32.totalorder %s1910_s28, %s1210_s13 }
  0x69   : > { %v495_v20 = vmax.bf16 %v980_v16, %v979_v15  ;;  %v510_v61 = vunpack.c.l.bf16 %v1562_v11  ;;  %v439_v63 = vand.u32 2147450879, %v1568_v14  ;;  %v511_v7 = vunpack.c.h.bf16 %v1562_v11 }
  0x6a   : > { %v496_v21 = vmax.bf16 %v982_v19, %v981_v18  ;;  %v512_v10 = vunpack.c.l.bf16 %v1564_v12  ;;  %vm1660_vm2 = vcmp.eq.bf16.partialorder %v438_v55, 2139127680  ;;  %v517_v62 = vunpack.c.h.bf16 %v1568_v14  ;;  %p1212_p9 = pnand %p1211_p12, %p2020_p4 }
  0x6b   : > { %vm1676_vm4 = vcmp.eq.bf16.partialorder %v439_v63, 2139127680  ;;  %vm446_vm5 = vmor %vm1656_vm1, %vm1660_vm2 }
  0x6c   : > { %v497_v22 = vmax.bf16 %v496_v21, %v495_v20  ;;  %vm447_vm6 = vmor %vm1672_vm3, %vm1676_vm4  ;;  %p1213_p2 = pneg %p1212_p9 }
  0x6d   : > { %v581_v15 = vsel %vm447_vm6, 65537, %v1324_v23 }
  0x6e   : > { %498 = vmax.xlane.bf16.xlu0 %v497_v22  ;;  %v429_v22 = vand.u32 2147450879, %v1542_v2 }
  0x70   : > { %vm1748_vm12 = vcmp.eq.bf16.partialorder %v429_v22, 2139127680 }
  0xf6   : > { %v472_v25 = vpop.xlane.xlu0 %471 }
  0xf7   : > { %v473_v28 = vunpack.c.l.bf16 %v472_v25  ;;  %v474_v29 = vunpack.c.h.bf16 %v472_v25 }
  0xf9   : > { %v1595_v30 = vmax.f32 %v1590_v26, %v473_v28  ;;  %v1598_v31 = vmax.f32 %v1592_v27, %v474_v29 }
  0xfb   : > { %v522_v32 = vsub.f32 %v1590_v26, %v1595_v30  ;;  %v523_v33 = vsub.f32 %v1592_v27, %v1598_v31  ;;  %669 = vst.msk [vmem:[#allocation3] sm:$0xff] %vm401_vm0, %v1595_v30  ;;  %670 = vst.msk [vmem:[#allocation3 + $0x8] sm:$0xff] %vm401_vm0, %v1598_v31  ;;  %530 = vperm.xlu1 %1088, %v1595_v30  }
  0xff   : > { %v499_v34 = vpop.xlane.xlu0 %498  ;;  %535 = vperm.xlu1 %1088, %v1598_v31  }
 0x100   : > { %v500_v37 = vunpack.c.l.bf16 %v499_v34  ;;  %v501_v38 = vunpack.c.h.bf16 %v499_v34 }
 0x102   : > { %v1615_v39 = vmax.f32 %v1609_v35, %v500_v37  ;;  %v1618_v40 = vmax.f32 %v1611_v36, %v501_v38  ;;  %v513_v37 = vunpack.c.h.bf16 %v1564_v12 }
 0x104   : > { %v675_v41 = vsub.f32 %v1609_v35, %v1615_v39  ;;  %v676_v42 = vsub.f32 %v1611_v36, %v1618_v40  ;;  %733 = vst.msk [vmem:[#allocation7] sm:$0xff] %vm401_vm0, %v1615_v39  ;;  %734 = vst.msk [vmem:[#allocation7 + $0x8] sm:$0xff] %vm401_vm0, %v1618_v40  ;;  %692 = vperm.xlu0 %1089, %v1618_v40   ;;  %687 = vperm.xlu1 %1088, %v1615_v39   ;;  %v681_v36 = vld [vmem:[#allocation8] sm:$0xff] }
 0x17a   : > { %v531_v51 = vpop.permute.xlu1 %530 }
 0x17b   : > { %v538_v56 = vsub.f32 %v502_v43, %v531_v51  ;;  %v539_v57 = vsub.f32 %v503_v44, %v531_v51  ;;  %v540_v58 = vsub.f32 %v504_v45, %v531_v51  ;;  %v541_v59 = vsub.f32 %v505_v46, %v531_v51 }
 0x17c   : > { %v428_v51 = vand.u32 2147450879, %v1540_v1  ;;  %v566_v1 = vsub.f32 %v514_v52, %v506_v47 }
 0x17d   : > { %v546_v0 = vmul.f32 1.442695, %v538_v56  ;;  %v548_v5 = vmul.f32 1.442695, %v539_v57  ;;  %v550_v6 = vmul.f32 1.442695, %v540_v58 }
 0x17e   : > { %v552_v8 = vmul.f32 1.442695, %v541_v59  ;;  %v536_v9 = vpop.permute.xlu1 %535  ;;  %v436_v56 = vand.u32 2147450879, %v1562_v11  ;;  %v580_v59 = vsel %vm446_vm5, 65537, %v1324_v23  ;;  %v567_v11 = vsub.f32 %v515_v53, %v507_v48 }
 0x17f   : > { %1098 = vpow2.f32 %v546_v0  ;;  %v542_v17 = vsub.f32 %v506_v47, %v536_v9  ;;  %v543_v18 = vsub.f32 %v507_v48, %v536_v9  ;;  %v544_v19 = vsub.f32 %v508_v49, %v536_v9 }
 0x180   : > { %1100 = vpow2.f32 %v548_v5  ;;  %v545_v20 = vsub.f32 %v509_v50, %v536_v9  ;;  %vm1708_vm7 = vcmp.eq.bf16.partialorder %v428_v51, 2139127680  ;;  %v586_v16 = vunpack.c.l.b16 %v580_v59 }
 0x181   : > { %1102 = vpow2.f32 %v550_v6  ;;  %v554_v24 = vmul.f32 1.442695, %v542_v17  ;;  %v556_v25 = vmul.f32 1.442695, %v543_v18  ;;  %v558_v28 = vmul.f32 1.442695, %v544_v19 }
 0x182   : > { %1104 = vpow2.f32 %v552_v8  ;;  %v560_v29 = vmul.f32 1.442695, %v545_v20  ;;  %v587_v19 = vunpack.c.h.b16 %v580_v59  ;;  %vm1717_vm8 = vcmp.eq.bf16.partialorder %v436_v56, 2139127680 }
 0x183   : > { %v693_v34 = vpop.permute.xlu0 %692  ;;  %v688_v38 = vpop.permute.xlu1 %687  ;;  %1106 = vpow2.f32 %v554_v24  ;;  %v437_v24 = vand.u32 2147450879, %v1564_v12  ;;  %v589_v51 = vunpack.c.h.b16 %v581_v15  ;;  %vm1731_vm9 = vcmp.ne.s32.totalorder %v586_v16, 0  ;;  %vm444_vm10 = vmor %vm1708_vm7, %vm1717_vm8 }
 0x184   : > { %v699_v54 = vsub.f32 %v514_v52, %v693_v34  ;;  %v700_v55 = vsub.f32 %v515_v53, %v693_v34  ;;  %1108 = vpow2.f32 %v556_v25  ;;  %v695_v57 = vsub.f32 %v510_v61, %v688_v38 }
 0x185   : > { %v696_v58 = vsub.f32 %v511_v7, %v688_v38  ;;  %1110 = vpow2.f32 %v558_v28  ;;  %v697_v5 = vsub.f32 %v512_v10, %v688_v38  ;;  %v701_v8 = vsub.f32 %v516_v60, %v693_v34 }
 0x186   : > { %v711_v63 = vmul.f32 1.442695, %v699_v54  ;;  %1112 = vpow2.f32 %v560_v29  ;;  %v713_v0 = vmul.f32 1.442695, %v700_v55  ;;  %v703_v9 = vmul.f32 1.442695, %v695_v57 }
 0x187   : > { %v698_v17 = vsub.f32 %v513_v37, %v688_v38  ;;  %v705_v18 = vmul.f32 1.442695, %v696_v58  ;;  %v707_v28 = vmul.f32 1.442695, %v697_v5  ;;  %v588_v29 = vunpack.c.l.b16 %v581_v15 }
 0x188   : > { %1114 = vpow2.f32 %v711_v63  ;;  %v715_v54 = vmul.f32 1.442695, %v701_v8  ;;  %v702_v58 = vsub.f32 %v517_v62, %v693_v34  ;;  %vm1743_vm11 = vcmp.ne.s32.totalorder %v587_v19, 0 }
 0x189   : > { %v1721_v21 = vpop.eup %1098  ;;  %1116 = vpow2.f32 %v713_v0  ;;  %v709_v59 = vmul.f32 1.442695, %v698_v17  ;;  %vm1752_vm13 = vcmp.eq.bf16.partialorder %v437_v24, 2139127680  ;;  %vm1756_vm14 = vcmp.ne.s32.totalorder %v588_v29, 0 }
 0x18a   : > { %v1725_v25 = vpop.eup %1100  ;;  %1118 = vpow2.f32 %v703_v9  ;;  %v578_v16 = vsel %vm444_vm10, 65537, %v1324_v23  ;;  %v717_v24 = vmul.f32 1.442695, %v702_v58  ;;  %vm1770_vm15 = vcmp.ne.s32.totalorder %v589_v51, 0  ;;  %vm445_vm1 = vmor %vm1748_vm12, %vm1752_vm13 }
 0x18b   : > { %v1727_v38 = vpop.eup %1102  ;;  %v618_v55 = vadd.f32 %v1725_v25, %v1721_v21  ;;  %1120 = vpow2.f32 %v705_v18  ;;  %v583_v58 = vunpack.c.h.b16 %v578_v16  ;;  %v563_v8 = vsub.f32 %v511_v7, %v503_v44 }
 0x18c   : > { %v1739_v57 = vpop.eup %1104  ;;  %1122 = vpow2.f32 %v707_v28  ;;  %v564_v53 = vsub.f32 %v512_v10, %v504_v45  ;;  %v565_v10 = vsub.f32 %v513_v37, %v505_v46  ;;  %v569_v46 = vsub.f32 %v517_v62, %v509_v50 }
 0x18d   : > { %v1107_v0 = vpop.eup %1106  ;;  %v619_v5 = vadd.f32 %v1727_v38, %v618_v55  ;;  %1124 = vpow2.f32 %v715_v54  ;;  %vm1799_vm3 = vcmp.ne.s32.totalorder %v583_v58, 0  ;;  %v571_v52 = vmul.f32 %v1725_v25, %v563_v8 }
 0x18e   : > { %v1109_v9 = vpop.eup %1108  ;;  %v610_v15 = vsel %vm1731_vm9, 0.0, %v1107_v0  ;;  %1126 = vpow2.f32 %v709_v59  ;;  %v677_v34 = vmul.f32 1.442695, %v675_v41  ;;  %v679_v28 = vmul.f32 1.442695, %v676_v42 }
 0x18f   : > { %v1763_v17 = vpop.eup %1110  ;;  %v620_v18 = vadd.f32 %v1739_v57, %v619_v5  ;;  %v623_v19 = vadd.f32 %v1109_v9, %v1107_v0  ;;  %v611_v20 = vsel %vm1743_vm11, 0.0, %v1109_v9  ;;  %v582_v5 = vunpack.c.l.b16 %v578_v16 }
 0x190   : > { %v1768_v22 = vpop.eup %1112  ;;  %v660_v29 = vadd.f32 %v611_v20, %v610_v15  ;;  %v612_v54 = vsel %vm1756_vm14, 0.0, %v1763_v17  ;;  %v562_v15 = vsub.f32 %v510_v61, %v502_v43  ;;  %1128 = vpow2.f32 %v717_v24 }
 0x191   : > { %621 = vadd.xlane.f32.xlu1 %v620_v18  ;;  %v624_v55 = vadd.f32 %v1763_v17, %v623_v19  ;;  %v613_v19 = vsel %vm1770_vm15, 0.0, %v1768_v22  ;;  %v579_v16 = vsel %vm445_vm1, 65537, %v1324_v23  ;;  %vm1795_vm2 = vcmp.ne.s32.totalorder %v582_v5, 0 }
 0x192   : > { %v661_v59 = vadd.f32 %v660_v29, %v612_v54  ;;  %v1115_v51 = vpop.eup %1114  ;;  %v584_v7 = vunpack.c.l.b16 %v579_v16  ;;  %v606_v54 = vsel %vm1795_vm2, 0.0, %v1721_v21  ;;  %v607_v5 = vsel %vm1799_vm3, 0.0, %v1725_v25 }
 0x193   : > { %v625_v18 = vadd.f32 %v1768_v22, %v624_v55  ;;  %v1117_v20 = vpop.eup %1116  ;;  %v570_v47 = vmul.f32 %v1721_v21, %v562_v15  ;;  %v585_v48 = vunpack.c.h.b16 %v579_v16  ;;  %v599_v25 = vsel %vm1799_vm3, 0.0, %v571_v52 }
 0x194   : > { %v662_v6 = vadd.f32 %v661_v59, %v613_v19  ;;  %v1119_v29 = vpop.eup %1118  ;;  %v724_v44 = vadd.f32 %v1117_v20, %v1115_v51  ;;  %vm1823_vm4 = vcmp.ne.s32.totalorder %v584_v7, 0  ;;  %v655_v19 = vadd.f32 %v607_v5, %v606_v54 }
 0x195   : > { %626 = vadd.xlane.f32.xlu1 %v625_v18  ;;  %v1121_v55 = vpop.eup %1120  ;;  %v598_v21 = vsel %vm1795_vm2, 0.0, %v570_v47  ;;  %v574_v15 = vmul.f32 %v1107_v0, %v566_v1  ;;  %v575_v20 = vmul.f32 %v1109_v9, %v567_v11  ;;  %v608_v45 = vsel %vm1823_vm4, 0.0, %v1727_v38  ;;  %v682_v47 = vld [vmem:[#allocation8 + $0x8] sm:$0xff] }
 0x196   : > { %663 = vadd.xlane.f32.xlu0 %v662_v6  ;;  %v719_v23 = vadd.f32 %v1121_v55, %v1119_v29  ;;  %v1123_v24 = vpop.eup %1122  ;;  %v572_v6 = vmul.f32 %v1727_v38, %v564_v53  ;;  %v568_v16 = vsub.f32 %v516_v60, %v508_v49  ;;  %vm1843_vm5 = vcmp.ne.s32.totalorder %v585_v48, 0  ;;  %v651_v48 = vld [vmem:[#allocation6] sm:$0xff] }
 0x197   : > { %v1125_v3 = vpop.eup %1124  ;;  %v656_v29 = vadd.f32 %v655_v19, %v608_v45  ;;  %v637_v43 = vadd.f32 %v599_v25, %v598_v21  ;;  %v602_v2 = vsel %vm1731_vm9, 0.0, %v574_v15  ;;  %v603_v12 = vsel %vm1743_vm11, 0.0, %v575_v20  ;;  %v633_v19 = vld [vmem:[#allocation5] sm:$0xff] }
 0x198   : > { %v720_v58 = vadd.f32 %v1123_v24, %v719_v23  ;;  %v1127_v13 = vpop.eup %1126  ;;  %v725_v51 = vadd.f32 %v1125_v3, %v724_v44  ;;  %v609_v49 = vsel %vm1843_vm5, 0.0, %v1739_v57  ;;  %v573_v60 = vmul.f32 %v1739_v57, %v565_v10  ;;  %v614_v23 = vld [vmem:[#allocation4] sm:$0xff]  ;;  %v652_v24 = vld [vmem:[#allocation6 + $0x8] sm:$0xff] }
 0x199   : > { %v600_v37 = vsel %vm1823_vm4, 0.0, %v572_v6  ;;  %v576_v38 = vmul.f32 %v1763_v17, %v568_v16  ;;  %v657_v56 = vadd.f32 %v656_v29, %v609_v49  ;;  %v642_v61 = vadd.f32 %v603_v12, %v602_v2 }
 0x19a   : > { %v721_v59 = vadd.f32 %v1127_v13, %v720_v58  ;;  %v1129_v8 = vpop.eup %1128  ;;  %v638_v63 = vadd.f32 %v637_v43, %v600_v37  ;;  %v601_v4 = vsel %vm1843_vm5, 0.0, %v573_v60  ;;  %v577_v14 = vmul.f32 %v1768_v22, %v569_v46 }
 0x19b   : > { %v726_v0 = vadd.f32 %v1129_v8, %v725_v51  ;;  %v604_v50 = vsel %vm1756_vm14, 0.0, %v576_v38  ;;  %v524_v17 = vmul.f32 1.442695, %v522_v32  ;;  %v526_v22 = vmul.f32 1.442695, %v523_v33  ;;  %v615_v32 = vld [vmem:[#allocation4 + $0x8] sm:$0xff] }
 0x19c   : > { %722 = vadd.xlane.f32.xlu1 %v721_v59  ;;  %v639_v62 = vadd.f32 %v638_v63, %v601_v4  ;;  %v643_v55 = vadd.f32 %v642_v61, %v604_v50  ;;  %v605_v57 = vsel %vm1770_vm15, 0.0, %v577_v14  ;;  %v634_v8 = vld [vmem:[#allocation5 + $0x8] sm:$0xff]  ;;  %v778_v6 = vlaneseq  ;;  %v738_v63 = vld [vmem:[#allocation7] sm:$0xff] }
 0x19d   : > { %1130 = vpow2.f32 %v524_v17  ;;  %v781_v12 = vstv %s983_s9  ;;  %v749_v17 = vld [vmem:[#allocation3 + $0x8] sm:$0xff] }
 0x19e   : > { %v644_v1 = vadd.f32 %v643_v55, %v605_v57  ;;  %1132 = vpow2.f32 %v526_v22  ;;  %v779_v43 = vshrl.u32 %v778_v6, 7  ;;  %v739_v22 = vld [vmem:[#allocation7 + $0x8] sm:$0xff] }
 0x19f   : > { %1134 = vpow2.f32 %v677_v34 }
 0x1a0   : > { %727 = vadd.xlane.f32.xlu1 %v726_v0  ;;  %1136 = vpow2.f32 %v679_v28  ;;  %v780_v37 = vadd.s32 8, %v779_v43  ;;  %v782_v38 = vadd.s32 %v781_v12, %v779_v43 }
 0x1a2   : > { %vm784_vm6 = vcmp.lt.s32.totalorder %v782_v38, 16 }
 0x1a4   : > { %658 = vadd.xlane.f32.xlu1 %v657_v56  ;;  %v748_v56 = vld [vmem:[#allocation3] sm:$0xff] }
 0x1a7   : > { %v1131_v11 = vpop.eup %1130 }
 0x1a8   : > { %640 = vadd.xlane.f32.xlu1 %v639_v62  ;;  %v616_v44 = vmul.f32 %v1131_v11, %v614_v23  ;;  %v1133_v26 = vpop.eup %1132  ;;  %v653_v51 = vmul.f32 %v1131_v11, %v651_v48  ;;  %v635_v15 = vmul.f32 %v1131_v11, %v633_v19  ;;  %v772_v62 = vld [vmem:[%s364_s11] sm:$0xff] }
 0x1a9   : > { %v617_v27 = vmul.f32 %v1133_v26, %v615_v32  ;;  %v654_v33 = vmul.f32 %v1133_v26, %v652_v24  ;;  %v1135_v54 = vpop.eup %1134  ;;  %v636_v16 = vmul.f32 %v1133_v26, %v634_v8  ;;  %vm774_vm7 = vcmp.ne.s32.totalorder %v772_v62, 4294967196 }
 0x1aa   : > { %v683_v40 = vmul.f32 %v1135_v54, %v681_v36  ;;  %v1137_v42 = vpop.eup %1136  ;;  %vm786_vm8 = vmand %vm774_vm7, %vm784_vm6 }
 0x1ab   : > { %v684_v3 = vmul.f32 %v1137_v42, %v682_v47  ;;  %v789_v42 = vld [vmem:[#allocation2 + $0x8] sm:$0xff] }
 0x1ac   : > { %645 = vadd.xlane.f32.xlu1 %v644_v1  ;;  %v783_v1 = vadd.s32 %v781_v12, %v780_v37 }
 0x1ae   : > { %vm785_vm10 = vcmp.lt.s32.totalorder %v783_v1, 16 }
 0x21e   : > { %v622_v30 = vpop.xlane.xlu1 %621 }
 0x21f   : > { %v628_v7 = vadd.f32 %v622_v30, %v616_v44  ;;  %v773_v44 = vld [vmem:[%s364_s11 + $0x8] sm:$0xff] }
 0x220   : > { %vm775_vm9 = vcmp.ne.s32.totalorder %v773_v44, 4294967196 }
 0x221   : > { %631 = vst.msk [vmem:[#allocation4] sm:$0xff] %vm401_vm0, %v628_v7  ;;  %vm787_vm11 = vmand %vm775_vm9, %vm785_vm10 }
 0x222   : > { %v627_v31 = vpop.xlane.xlu1 %626 }
 0x223   : > { %v629_v35 = vadd.f32 %v627_v31, %v617_v27  ;;  %v664_v39 = vpop.xlane.xlu0 %663 }
 0x224   : > { %v666_v41 = vadd.f32 %v664_v39, %v654_v33  ;;  %v788_v33 = vld [vmem:[#allocation2] sm:$0xff] }
 0x225   : > { %632 = vst.msk [vmem:[#allocation4 + $0x8] sm:$0xff] %vm401_vm0, %v629_v35 }
 0x226   : > { %668 = vst.msk [vmem:[#allocation6 + $0x8] sm:$0xff] %vm401_vm0, %v666_v41 }
 0x228   : > { %v750_v58 = vld [vmem:[#allocation4] sm:$0xff] }
 0x229   : > { %v723_v5 = vpop.xlane.xlu1 %722  ;;  %1138 = vlog2.f32 %v750_v58 }
 0x22a   : > { %v729_v52 = vadd.f32 %v723_v5, %v683_v40 }
 0x22c   : > { %731 = vst.msk [vmem:[#allocation8] sm:$0xff] %vm401_vm0, %v729_v52  ;;  %v751_v59 = vld [vmem:[#allocation4 + $0x8] sm:$0xff] }
 0x22d   : > { %v728_v13 = vpop.xlane.xlu1 %727  ;;  %1140 = vlog2.f32 %v751_v59  ;;  %v763_v24 = vld [vmem:[#allocation6 + $0x8] sm:$0xff] }
 0x22e   : > { %v730_v53 = vadd.f32 %v728_v13, %v684_v3 }
 0x230   : > { %732 = vst.msk [vmem:[#allocation8 + $0x8] sm:$0xff] %vm401_vm0, %v730_v53 }
 0x231   : > { %v659_v18 = vpop.xlane.xlu1 %658 }
 0x232   : > { %v665_v21 = vadd.f32 %v659_v18, %v653_v51 }
 0x233   : > { %v740_v25 = vld [vmem:[#allocation8] sm:$0xff]  ;;  %v1139_v9 = vpop.eup %1138 }
 0x234   : > { %1142 = vlog2.f32 %v740_v25  ;;  %667 = vst.msk [vmem:[#allocation6] sm:$0xff] %vm401_vm0, %v665_v21  ;;  %v753_v46 = vmul.f32 0.6931472, %v1139_v9 }
 0x235   : > { %v641_v20 = vpop.xlane.xlu1 %640 }
 0x236   : > { %v647_v45 = vadd.f32 %v641_v20, %v635_v15  ;;  %v756_v14 = vadd.f32 %v753_v46, %v748_v56  ;;  %v798_v15 = vld [vmem:[%s299_s12] sm:$0x1]  ;;  %s1326_s12 = smov [#allocation14]  }
 0x237   : > { %v741_v10 = vld [vmem:[#allocation8 + $0x8] sm:$0xff]  ;;  %v1141_v2 = vpop.eup %1140  ;;  %s1214_s23 = sshll.u32 %s1326_s12, 4  ;;  %s1215_s23 = int_to_ptr.vmem [resolvable:$false] %s1214_s23 }
 0x238   : > { %1144 = vlog2.f32 %v741_v10  ;;  %649 = vst.msk [vmem:[#allocation5] sm:$0xff] %vm401_vm0, %v647_v45  ;;  %v755_v61 = vmul.f32 0.6931472, %v1141_v2  ;;  %s1216_s20 = scalar_lea.vmem %s1215_s23, 32  ;;  %p1217_p0 = scmp.lt.s32.totalorder %s1910_s28, %s1215_s23 }
 0x239   : > { %v646_v0 = vpop.xlane.xlu1 %645  ;;  %1146 = vrcp.f32 %v750_v58  ;;  %p1218_p8 = scmp.lt.s32.totalorder %s1216_s20, %s1210_s13 }
 0x23a   : > { %v648_v29 = vadd.f32 %v646_v0, %v636_v16  ;;  %1148 = vrcp.f32 %v751_v59  ;;  %v757_v11 = vadd.f32 %v755_v61, %v749_v17 }
 0x23b   : > { %v762_v34 = vld [vmem:[#allocation6] sm:$0xff]  ;;  %p1219_p7 = por %p1218_p8, %p1217_p0 }
 0x23c   : > { %650 = vst.msk [vmem:[#allocation5 + $0x8] sm:$0xff] %vm401_vm0, %v648_v29 }
 0x23d   : > { %p1220_p3 = pnand %p1219_p7, %p1213_p2 }
 0x23e   : > { %v1143_v49 = vpop.eup %1142 }
 0x23f   : > { %v743_v60 = vmul.f32 0.6931472, %v1143_v49  ;;  %v760_v26 = vld [vmem:[#allocation5] sm:$0xff] }
 0x241   : > { %v746_v4 = vadd.f32 %v743_v60, %v738_v63 }
 0x242   : > { %v1145_v50 = vpop.eup %1144 }
 0x243   : > { %v745_v55 = vmul.f32 0.6931472, %v1145_v50  ;;  %v758_v57 = vsub.f32 %v746_v4, %v756_v14  ;;  %v1147_v7 = vpop.eup %1146  ;;  %v761_v35 = vld [vmem:[#allocation5 + $0x8] sm:$0xff] }
 0x244   : > { %v1149_v54 = vpop.eup %1148 }
 0x245   : > { %v747_v23 = vadd.f32 %v745_v55, %v739_v22  ;;  %v764_v28 = vmul.f32 %v762_v34, %v758_v57 }
 0x247   : > { %v766_v30 = vsub.f32 %v760_v26, %v764_v28  ;;  %v759_v32 = vsub.f32 %v747_v23, %v757_v11 }
 0x249   : > { %v769_v27 = vmul.f32 %v1147_v7, %v766_v30  ;;  %v765_v31 = vmul.f32 %v763_v24, %v759_v32 }
 0x24b   : > { %v767_v39 = vsub.f32 %v761_v35, %v765_v31  ;;  %v790_v41 = vsel %vm786_vm8, %v769_v27, 0.0 }
 0x24c   : > { %v792_v36 = vadd.f32 %v790_v41, %v788_v33 }
 0x24d   : > { %v771_v40 = vmul.f32 %v1149_v54, %v767_v39 }
 0x24e   : > { %794 = vst.msk [vmem:[#allocation2] sm:$0xff] %vm401_vm0, %v792_v36 }
 0x24f   : > { %v791_v5 = vsel %vm787_vm11, %v771_v40, 0.0 }
 0x250   : > { %v793_v47 = vadd.f32 %v791_v5, %v789_v42 }
 0x252   : > { %795 = vst.msk [vmem:[#allocation2 + $0x8] sm:$0xff] %vm401_vm0, %v793_v47 }
 0x255   : > { %v799_v52 = vld [vmem:[#allocation2] sm:$0xff] }
 0x256   : > { %v801_v58 = vsel %vm401_vm0, %v799_v52, 0.0 }
 0x259   : > { %v800_v3 = vld [vmem:[#allocation2 + $0x8] sm:$0xff] }
 0x25a   : > { %v802_v13 = vsel %vm401_vm0, %v800_v3, 0.0 }
 0x25b   : > { %v803_v48 = vadd.f32 %v802_v13, %v801_v58 }
 0x25d   : > { %804 = vadd.xlane.f32.xlu1 %v803_v48 }
 0x2ea   : > { %v805_v53 = vpop.xlane.xlu1 %804 }
 0x2eb   : > { %v806_v59 = vrot.slane %v805_v53, 4 }
 0x2ed   : > { %v807_v51 = vadd.f32 %v806_v59, %v805_v53 }
 0x2ef   : > { %v808_v18 = vrot.slane %v807_v51, 2 }
 0x2f1   : > { %v809_v19 = vadd.f32 %v808_v18, %v807_v51 }
 0x2f3   : > { %v810_v21 = vrot.slane %v809_v19, 1 }
 0x2f5   : > { %v811_v25 = vadd.f32 %v810_v21, %v809_v19 }
 0x2f7   : > { %990 = vpush %v811_v25 }
 0x328   : > { %s991_s29 = spop %990 }
 0x329   : > { %v813_v20 = vstv %s991_s29 }
 0x32a   : > { %v814_v8 = vadd.f32 %v813_v20, %v798_v15 }
 0x32c   : > { %815 = vst [vmem:[%s356_s15] sm:$0x1] %v814_v8 }
 0x32d   : > { %1223 = shalt.err (!%p1220_p3)
}
 0x32e   : > { %s1224_s14 = scalar_lea.hbm %s1908_s10, 16  ;;  %s1228_s24 = scalar_lea.hbm %s1966_s4, 32 }
 0x32f   : > { %p1225_p1 = scmp.ne.s32.totalorder %s1908_s10, %s1224_s14  ;;  %p1229_p10 = scmp.lt.u32.totalorder %s1908_s10, %s1966_s4 }
 0x330   : > { %p1230_p11 = scmp.lt.u32.totalorder %s1228_s24, %s1224_s14  ;;  %p1232_p12 = scmp.lt.u32.totalorder %s1224_s14, %s1908_s10 }
 0x331   : > { %p1226_p13 = pnand %p1225_p1, %p2020_p4 }
 0x332   : > { %p1231_p6 = por %p1230_p11, %p1229_p10 }
 0x333   : > { %p1227_p5 = pneg %p1226_p13 }
 0x334   : > { %p1233_p9 = por %p1232_p12, %p1231_p6 }
 0x336   : > { %p1234_p2 = pnand %p1233_p9, %p1227_p5 }
 0x338   : > { %1237 = shalt.err (!%p1234_p2)
}
 0x339   : > { %996 = dma.vmem_to_hbm [thread:$0]  (%p2020_p4), %s1910_s28, 16, %s1908_s10, %s817_s30  }
 0x33a PF: > { %s841_s29 = sand.u32 1, %s1297_s17   ;;  %p2021_p0 = scmp.ne.s32.totalorder %s1978_s8, 0 }
 0x33b   : > { %p2022_p8 = scmp.ge.s32.totalorder %s1317_s22, 2  ;;  %s842_s26 = scalar_lea.sflag [#allocation11], %s841_s29 }
 0x33d   : > { %p1006_p7 = pnand %p2022_p8, %p2021_p0 }
 0x33f   : > { %1283 = dma.done.wait (!%p1006_p7), %s842_s26, 16  }
 0x340   : > { %1285 = vsyncadd (!%p1006_p7), %s842_s26, 4294967280  ;;  %s23_s22 = sadd.s32 1, %s1317_s22   ;;  %s2023_s15 = smov %s1293_s16 }
 0x341   : > { %p20_p3 = scmp.ge.s32.totalorder %s23_s22, 4   ;;  %s1943_s16 = smov 0  }
 0x342   : > { %s2024_s17 = smov %s1301_s18  ;;  %s2025_s18 = smov %s1305_s19 }
 0x343   : > { %s2026_s19 = smov %s1424_s5  ;;  %s2027_s20 = smov %s1313_s21 }
 0x344   : > { %s2028_s21 = smov %s2030_s25  ;;  %22 = sbr.rel (!%p20_p3) target bundleno = 9 (0x9), region = 116 }
 0x34b   :  { %846 = vsyncpa [#allocation10], 1 }
 0x34c   :  { %848 = vsyncpa [#allocation10 + $0x1], 1 }
 0x34d   :  { %849 = vsyncpa [#allocation13], 1 }
 0x34e   :  { %851 = vsyncpa [#allocation13 + $0x1], 1 }
 0x34f   :  { %852 = vsyncpa [#allocation11], 1 }
 0x350   :  { %854 = vsyncpa [#allocation11 + $0x1], 1 }

</bundles_post_ra>
